<compile_context>
chip_gen: v5e
topology: v5e:2x2
jax: 0.10.0
libtpu: 0.0.40
codegen_flags: <defaults>
</compile_context>

<pallas_src>
import functools

import jax
import jax.numpy as jnp
from jax import lax
from jax.experimental import pallas as pl
from jax.experimental.pallas import tpu as pltpu


# ---------------------------------------------------------------------------
# chip detection & helpers
# ---------------------------------------------------------------------------

@functools.lru_cache(maxsize=None)
def _chip() -> str:
    try:
        kind = jax.devices()[0].device_kind.lower()
    except Exception:
        return "other"
    if "v5 lite" in kind or "v5e" in kind or "v5lite" in kind:
        return "v5e"
    if "v7" in kind:
        return "v7x"
    if "v6" in kind:
        return "v6e"
    return "other"


def _use_bf16_exp() -> bool:
    # bf16 EUP exists on v6e/v7x; v5e (and older) keep exp in f32.
    return _chip() in ("v6e", "v7x")


def _pick_tile(total, candidates):
    """Largest candidate that evenly divides `total`, else `total` (full dim)."""
    for c in candidates:
        if c <= total and total % c == 0:
            return c
    return total


def _vmem_limit(working_set_bytes):
    """Generation-aware scoped VMEM limit: 2x working-set headroom, >=16 MiB,
    capped below physical VMEM (64 MiB on v7x, 128 MiB on v5e/v6e)."""
    cap = 40 * 1024 * 1024 if _chip() == "v7x" else 100 * 1024 * 1024
    return int(min(max(2 * working_set_bytes, 16 * 1024 * 1024), cap))


def _row_tile(nt):
    """Projection row tile: 1024-first on 128 MiB-VMEM parts, 512 cap on v7x."""
    if _chip() == "v7x":
        cands = (512, 256, 128, 64, 32, 16, 8)
    else:
        cands = (1024, 512, 256, 128, 64, 32, 16, 8)
    return _pick_tile(nt, cands)


def _heads_per_group(d_head, n_head):
    """#heads packed per attention program so the feature block is lane-dense:
    a multiple of 128 lanes, or the full feature dim as a fallback."""
    if d_head % 128 == 0:
        return 1
    if 128 % d_head == 0:
        hb = 128 // d_head
        if n_head % hb == 0:
            return hb
    return n_head   # one group covers the whole feature dim (block == full dim)


def _attn_tiles(t):
    chip = _chip()
    if chip == "v5e":
        tq_c, tk_c = (128, 64, 32, 16, 8), (128, 64, 32, 16, 8)
    else:   # v6e / v7x / other
        tq_c, tk_c = (128, 64, 32, 16, 8), (256, 128, 64, 32, 16, 8)
    return _pick_tile(t, tq_c), _pick_tile(t, tk_c)


def _kv_spec(tk, gd):
    idx = lambda b, g, i, j: (b, j, g)
    if _chip() == "v7x" and hasattr(pl, "Buffered"):
        try:    # deeper K/V pipeline on v7x (smaller tiles + 3.2 TB/s HBM)
            return pl.BlockSpec((1, tk, gd), idx, pipeline_mode=pl.Buffered(3))
        except TypeError:
            pass
    return pl.BlockSpec((1, tk, gd), idx)


# ---------------------------------------------------------------------------
# kernel 1: fused QKV projection (row tiles, lane-dense (rm, D) outputs)
# ---------------------------------------------------------------------------

def _qkv_proj_kernel(x_ref, wq_ref, bq_ref, wk_ref, wv_ref, bv_ref,
                     q_ref, k_ref, v_ref):
    # x streamed at its native dtype (pass bf16 activations to halve the
    # stream); cast to bf16 in VMEM for the MXU, accumulate in f32.
    x = x_ref[...].astype(jnp.bfloat16)
    q = jnp.dot(x, wq_ref[...], preferred_element_type=jnp.float32) + bq_ref[...]
    k = jnp.dot(x, wk_ref[...], preferred_element_type=jnp.float32)
    v = jnp.dot(x, wv_ref[...], preferred_element_type=jnp.float32) + bv_ref[...]
    q_ref[...] = q.astype(q_ref.dtype)
    k_ref[...] = k.astype(k_ref.dtype)
    v_ref[...] = v.astype(v_ref.dtype)


def _qkv_projection(x2d, wq_t, bq, wk_t, wv_t, bv):
    nt, d_in = x2d.shape
    d_out = wq_t.shape[1]
    rm = _row_tile(nt)
    xb = x2d.dtype.itemsize

    def const(shape):
        return pl.BlockSpec(shape, lambda i: (0, 0))

    est = (2 * rm * d_in * xb                               # x tiles
           + 2 * (3 * d_in * d_out * 2 + 2 * d_out * 4)     # weights + biases
           + 2 * 3 * rm * d_out * 2)                        # q/k/v tiles
    return pl.pallas_call(
        _qkv_proj_kernel,
        out_shape=(jax.ShapeDtypeStruct((nt, d_out), jnp.bfloat16),) * 3,
        grid_spec=pltpu.PrefetchScalarGridSpec(
            num_scalar_prefetch=0,
            grid=(nt // rm,),
            in_specs=[pl.BlockSpec((rm, d_in), lambda i: (i, 0)),
                      const((d_in, d_out)), const((1, d_out)),
                      const((d_in, d_out)),
                      const((d_in, d_out)), const((1, d_out))],
            out_specs=[pl.BlockSpec((rm, d_out), lambda i: (i, 0))
                       for _ in range(3)],
        ),
        compiler_params=pltpu.CompilerParams(
            dimension_semantics=("parallel",),
            vmem_limit_bytes=_vmem_limit(est)),
    )(x2d, wq_t, bq, wk_t, wv_t, bv)


# ---------------------------------------------------------------------------
# kernel 2: flash attention on packed-lane head groups
# ---------------------------------------------------------------------------

def _flash_attn_kernel(*refs, d_head, hb, tq, tk, causal, has_mask, bf16_exp):
    if has_mask:
        q_ref, k_ref, v_ref, mask_ref, o_ref, m_sc, l_sc, acc_sc = refs
    else:
        q_ref, k_ref, v_ref, o_ref, m_sc, l_sc, acc_sc = refs
        mask_ref = None

    qi = pl.program_id(2)
    ki = pl.program_id(3)

    @pl.when(ki == 0)
    def _init():
        m_sc[...] = jnp.full(m_sc.shape, -1e30, dtype=m_sc.dtype)
        l_sc[...] = jnp.zeros(l_sc.shape, dtype=l_sc.dtype)
        acc_sc[...] = jnp.zeros(acc_sc.shape, dtype=acc_sc.dtype)

    def _update():
        q = q_ref[0]                           # (tq, hb*dh) bf16, scale folded
        k = k_ref[0]                           # (tk, hb*dh) bf16
        v = v_ref[0]                           # (tk, hb*dh) bf16

        if causal:
            # Synthesize the causal mask in-kernel: zero mask DMA.
            q_pos = qi * tq + lax.broadcasted_iota(jnp.int32, (tq, tk), 0)
            k_pos = ki * tk + lax.broadcasted_iota(jnp.int32, (tq, tk), 1)
            bias = jnp.where(q_pos >= k_pos, 0.0, -1e30).astype(jnp.float32)
        elif has_mask:
            bias = mask_ref[...].astype(jnp.float32)
        else:
            bias = None

        for h in range(hb):                    # static unroll over head group
            sl = slice(h * d_head, (h + 1) * d_head)
            s = lax.dot_general(q[:, sl], k[:, sl],
                                (((1,), (1,)), ((), ())),
                                preferred_element_type=jnp.float32)   # (tq, tk)
            if bias is not None:
                s = s + bias
            m_prev = m_sc[h]                                          # (tq, 1)
            m_new = jnp.maximum(m_prev, jnp.max(s, axis=-1, keepdims=True))
            alpha = jnp.exp(m_prev - m_new)
            z = s - m_new
            if bf16_exp:        # v6e/v7x: bf16 EUP exp, 2 elems/lane
                p_mm = jnp.exp(z.astype(jnp.bfloat16))
                p_sum = jnp.sum(p_mm.astype(jnp.float32), axis=-1, keepdims=True)
            else:               # v5e: f32 exp
                p = jnp.exp(z)
                p_sum = jnp.sum(p, axis=-1, keepdims=True)
                p_mm = p.astype(jnp.bfloat16)
            pv = lax.dot_general(p_mm, v[:, sl], (((1,), (0,)), ((), ())),
                                 preferred_element_type=jnp.float32)  # (tq, dh)
            l_sc[h] = alpha * l_sc[h] + p_sum
            acc_sc[:, sl] = alpha * acc_sc[:, sl] + pv
            m_sc[h] = m_new

    if causal:
        # Skip kv tiles that lie entirely above the diagonal.
        @pl.when(ki * tk <= qi * tq + (tq - 1))
        def _():
            _update()
    else:
        _update()

    @pl.when(ki == pl.num_programs(3) - 1)
    def _finalize():
        # Exact reciprocal: applied once per (batch, head-group, q-tile).
        parts = []
        for h in range(hb):
            sl = slice(h * d_head, (h + 1) * d_head)
            parts.append(acc_sc[:, sl] / l_sc[h])
        # One lane-dense (tq, hb*dh) store straight into the (N, T, D) context.
        o_ref[0] = jnp.concatenate(parts, axis=-1).astype(o_ref.dtype)


def _flash_attention(q, k, v, d_head, n_head, *, mask=None, causal=False):
    n, t, d = q.shape
    hb = _heads_per_group(d_head, n_head)
    gd = hb * d_head
    n_groups = n_head // hb
    tq, tk = _attn_tiles(t)
    grid = (n, n_groups, t // tq, t // tk)
    has_mask = (mask is not None) and (not causal)

    q_spec = pl.BlockSpec((1, tq, gd), lambda b, g, i, j: (b, i, g))
    o_spec = pl.BlockSpec((1, tq, gd), lambda b, g, i, j: (b, i, g))
    k_spec = _kv_spec(tk, gd)
    v_spec = _kv_spec(tk, gd)

    in_specs = [q_spec, k_spec, v_spec]
    args = [q, k, v]
    if has_mask:
        in_specs.append(pl.BlockSpec((tq, tk), lambda b, g, i, j: (i, j)))
        args.append(mask)

    est = (2 * 2 * (tq + 2 * tk) * gd * 2          # q/o + k/v (double-buffered)
           + (2 * tq * tk * 2 if has_mask else 0)  # mask blocks (bf16)
           + (tq * gd + 2 * hb * tq * 128) * 4     # scratch (lane-padded m/l)
           + 6 * tq * tk * 4)                      # s/p intermediates headroom

    kernel = functools.partial(
        _flash_attn_kernel, d_head=d_head, hb=hb, tq=tq, tk=tk,
        causal=causal, has_mask=has_mask, bf16_exp=_use_bf16_exp())

    return pl.pallas_call(
        kernel,
        out_shape=jax.ShapeDtypeStruct((n, t, d), jnp.bfloat16),
        grid_spec=pltpu.PrefetchScalarGridSpec(
            num_scalar_prefetch=0,
            grid=grid,
            in_specs=in_specs,
            out_specs=o_spec,
            scratch_shapes=[pltpu.VMEM((hb, tq, 1), jnp.float32),   # m
                            pltpu.VMEM((hb, tq, 1), jnp.float32),   # l
                            pltpu.VMEM((tq, gd), jnp.float32)],     # acc
        ),
        compiler_params=pltpu.CompilerParams(
            dimension_semantics=("parallel", "parallel", "parallel", "arbitrary"),
            vmem_limit_bytes=_vmem_limit(est)),
    )(*args)


# ---------------------------------------------------------------------------
# kernel 3: output projection
# ---------------------------------------------------------------------------

def _out_proj_kernel(x_ref, wo_ref, bo_ref, o_ref):
    o = jnp.dot(x_ref[...], wo_ref[...],
                preferred_element_type=jnp.float32) + bo_ref[...]
    o_ref[...] = o.astype(o_ref.dtype)


def _out_projection(ctx2d, wo_t, bo):
    nt, d_in = ctx2d.shape
    d_out = wo_t.shape[1]
    rm = _row_tile(nt)
    est = (2 * rm * d_in * 2
           + 2 * (d_in * d_out * 2 + d_out * 4)
           + 2 * rm * d_out * 4)
    return pl.pallas_call(
        _out_proj_kernel,
        out_shape=jax.ShapeDtypeStruct((nt, d_out), jnp.float32),
        grid_spec=pltpu.PrefetchScalarGridSpec(
            num_scalar_prefetch=0,
            grid=(nt // rm,),
            in_specs=[pl.BlockSpec((rm, d_in), lambda i: (i, 0)),
                      pl.BlockSpec((d_in, d_out), lambda i: (0, 0)),
                      pl.BlockSpec((1, d_out), lambda i: (0, 0))],
            out_specs=pl.BlockSpec((rm, d_out), lambda i: (i, 0)),
        ),
        compiler_params=pltpu.CompilerParams(
            dimension_semantics=("parallel",),
            vmem_limit_bytes=_vmem_limit(est)),
    )(ctx2d, wo_t, bo)


# ---------------------------------------------------------------------------
# parameters, module wrapper, reference
# ---------------------------------------------------------------------------

def init_mhsa_params(key, n_head: int, n_state: int):
    """torch.randn-style parameter init (shapes match the PyTorch Linear)."""
    d_head = n_state // n_head
    ks = jax.random.split(key, 7)
    return {
        "wq": jax.random.normal(ks[0], (n_head * d_head, n_state), jnp.float32),
        "bq": jax.random.normal(ks[1], (n_head * d_head,), jnp.float32),
        "wk": jax.random.normal(ks[2], (n_head * d_head, n_state), jnp.float32),
        "wv": jax.random.normal(ks[3], (n_head * d_head, n_state), jnp.float32),
        "bv": jax.random.normal(ks[4], (n_head * d_head,), jnp.float32),
        "wo": jax.random.normal(ks[5], (n_state, n_head * d_head), jnp.float32),
        "bo": jax.random.normal(ks[6], (n_state,), jnp.float32),
    }


def prepare_mhsa_params(params, n_head: int):
    """One-time host prep (call once, NOT per forward): transpose weights to
    (in, out), cast matmul operands to bf16, fold 1/sqrt(d_head) into wq/bq."""
    d_head = params["wq"].shape[0] // n_head
    sm = float(d_head) ** -0.5
    return {
        "wq_t": (params["wq"].T * sm).astype(jnp.bfloat16),
        "bq":   (params["bq"] * sm).reshape(1, -1).astype(jnp.float32),
        "wk_t": params["wk"].T.astype(jnp.bfloat16),
        "wv_t": params["wv"].T.astype(jnp.bfloat16),
        "bv":   params["bv"].reshape(1, -1).astype(jnp.float32),
        "wo_t": params["wo"].T.astype(jnp.bfloat16),
        "bo":   params["bo"].reshape(1, -1).astype(jnp.float32),
    }


def multi_head_self_attention(x, prepared, n_head: int, mask=None, causal=False):
    """x: (N, T, D).  mask: optional (T, T) additive mask (streamed as bf16).
    causal=True synthesizes the causal mask in-kernel (no mask DMA, skips
    fully-masked kv tiles) and takes precedence over `mask`."""
    N, T, D = x.shape
    d_head = D // n_head

    x2d = x.reshape(N * T, D)
    q2d, k2d, v2d = _qkv_projection(
        x2d, prepared["wq_t"], prepared["bq"], prepared["wk_t"],
        prepared["wv_t"], prepared["bv"])

    # Metadata-only reshapes: heads stay packed along lanes, no transposes.
    q = q2d.reshape(N, T, D)
    k = k2d.reshape(N, T, D)
    v = v2d.reshape(N, T, D)

    mask_arr = None
    if (mask is not None) and (not causal):
        mask_arr = mask[:T, :T].astype(jnp.bfloat16)

    ctx = _flash_attention(q, k, v, d_head, n_head,
                           mask=mask_arr, causal=causal)        # (N, T, D) bf16
    out2d = _out_projection(ctx.reshape(N * T, D),
                            prepared["wo_t"], prepared["bo"])   # (N*T, D) f32
    return out2d.reshape(N, T, D)


def _reference_mhsa(x, params, n_head, mask=None):
    """Pure-JAX reference mirroring the PyTorch forward."""
    N, T, D = x.shape
    d_head = D // n_head
    q = x @ params["wq"].T + params["bq"]
    k = x @ params["wk"].T
    v = x @ params["wv"].T + params["bv"]
    scale = d_head ** (-0.25)
    q = q.reshape(N, T, n_head, d_head).transpose(0, 2, 1, 3) * scale
    k = k.reshape(N, T, n_head, d_head).transpose(0, 2, 3, 1) * scale
    v = v.reshape(N, T, n_head, d_head).transpose(0, 2, 1, 3)
    qk = q @ k
    if mask is not None:
        qk = qk + mask[:T, :T]
    p = jax.nn.softmax(qk, axis=-1)
    qkv = p @ v
    qkv = qkv.transpose(0, 2, 1, 3).reshape(N, T, D)
    return qkv @ params["wo"].T + params["bo"]


if __name__ == "__main__":
    def rel_err(a, b):
        return float(jnp.max(jnp.abs(a.astype(jnp.float32) - b))
                     / jnp.max(jnp.abs(b)))

    k0, k1, k2, k3 = jax.random.split(jax.random.PRNGKey(0), 4)

    # --- small shape (module docstring scale) ------------------------------
    N, T, D, n_head = 2, 8, 32, 4
    x = 0.05 * jax.random.normal(k0, (N, T, D), jnp.float32)
    params = init_mhsa_params(k1, n_head, D)
    prepared = prepare_mhsa_params(params, n_head)

    causal_add = jnp.where(jnp.triu(jnp.ones((T, T), bool), k=1),
                           -1e9, 0.0).astype(jnp.float32)

    out_causal = jax.block_until_ready(
        multi_head_self_attention(x, prepared, n_head, causal=True))
    out_masked = jax.block_until_ready(
        multi_head_self_attention(x, prepared, n_head, mask=causal_add))
    out_plain = jax.block_until_ready(
        multi_head_self_attention(x, prepared, n_head))

    ref_masked = _reference_mhsa(x, params, n_head, mask=causal_add)
    ref_plain = _reference_mhsa(x, params, n_head)

    assert out_causal.shape == (N, T, D)
    assert out_masked.shape == (N, T, D)
    assert out_plain.shape == (N, T, D)
    assert rel_err(out_causal, ref_masked) < 5e-2, "mismatch (in-kernel causal)"
    assert rel_err(out_masked, ref_masked) < 5e-2, "mismatch (explicit mask)"
    assert rel_err(out_plain, ref_plain) < 5e-2, "mismatch (no mask)"

    # --- larger shape exercising multi-tile grid + multi head-group path ---
    N2, T2, D2, n_head2 = 1, 256, 256, 4    # d_head=64 -> 2 heads per group
    x2 = 0.05 * jax.random.normal(k2, (N2, T2, D2), jnp.float32)
    params2 = init_mhsa_params(k3, n_head2, D2)
    prepared2 = prepare_mhsa_params(params2, n_head2)

    out2 = jax.block_until_ready(
        multi_head_self_attention(x2, prepared2, n_head2, causal=True))
    causal_add2 = jnp.where(jnp.triu(jnp.ones((T2, T2), bool), k=1),
                            -1e9, 0.0).astype(jnp.float32)
    ref2 = _reference_mhsa(x2, params2, n_head2, mask=causal_add2)
    assert out2.shape == (N2, T2, D2)
    assert rel_err(out2, ref2) < 5e-2, "mismatch (large causal)"

    print("KERNEL_OK")
</pallas_src>

<mosaic_0001>
module attributes {stable_mosaic.version = 11 : i64} {
  func.func @_qkv_proj_kernel(%arg0: i32, %arg1: memref<16x32xf32, #tpu.memory_space<vmem>>, %arg2: memref<32x32xbf16, #tpu.memory_space<vmem>>, %arg3: memref<1x32xf32, #tpu.memory_space<vmem>>, %arg4: memref<32x32xbf16, #tpu.memory_space<vmem>>, %arg5: memref<32x32xbf16, #tpu.memory_space<vmem>>, %arg6: memref<1x32xf32, #tpu.memory_space<vmem>>, %arg7: memref<16x32xbf16, #tpu.memory_space<vmem>>, %arg8: memref<16x32xbf16, #tpu.memory_space<vmem>>, %arg9: memref<16x32xbf16, #tpu.memory_space<vmem>>) attributes {dimension_semantics = [#tpu.dimension_semantics<parallel>], iteration_bounds = array<i64: 1>, scalar_prefetch = 0 : i64, scratch_operands = 0 : i64, tpu.core_type = #tpu.core_type<tc>, window_params = [{transform_indices = @transform_0, window_bounds = array<i64: 16, 32>}, {pipeline_mode = #tpu.pipeline_mode<synchronous>, transform_indices = @transform_1, window_bounds = array<i64: 32, 32>}, {pipeline_mode = #tpu.pipeline_mode<synchronous>, transform_indices = @transform_2, window_bounds = array<i64: 1, 32>}, {pipeline_mode = #tpu.pipeline_mode<synchronous>, transform_indices = @transform_3, window_bounds = array<i64: 32, 32>}, {pipeline_mode = #tpu.pipeline_mode<synchronous>, transform_indices = @transform_4, window_bounds = array<i64: 32, 32>}, {pipeline_mode = #tpu.pipeline_mode<synchronous>, transform_indices = @transform_5, window_bounds = array<i64: 1, 32>}, {transform_indices = @transform_6, window_bounds = array<i64: 16, 32>}, {transform_indices = @transform_7, window_bounds = array<i64: 16, 32>}, {transform_indices = @transform_8, window_bounds = array<i64: 16, 32>}]} {
    %c0 = arith.constant 0 : index
    %c0_0 = arith.constant 0 : index
    %0 = vector.load %arg1[%c0, %c0_0] : memref<16x32xf32, #tpu.memory_space<vmem>>, vector<16x32xf32>
    %1 = arith.truncf %0 : vector<16x32xf32> to vector<16x32xbf16>
    %c0_1 = arith.constant 0 : index
    %c0_2 = arith.constant 0 : index
    %2 = vector.load %arg2[%c0_1, %c0_2] : memref<32x32xbf16, #tpu.memory_space<vmem>>, vector<32x32xbf16>
    %cst = arith.constant dense<0.000000e+00> : vector<16x32xf32>
    %3 = tpu.matmul %1, %2, %cst {dimension_numbers = #tpu.dot_dimension_numbers<[1], [0], [0], [1], [0, 0, 1, 1], [], []>} : vector<16x32xbf16>, vector<32x32xbf16>, vector<16x32xf32> -> vector<16x32xf32>
    %c0_3 = arith.constant 0 : index
    %c0_4 = arith.constant 0 : index
    %4 = vector.load %arg3[%c0_3, %c0_4] : memref<1x32xf32, #tpu.memory_space<vmem>>, vector<1x32xf32>
    %5 = vector.broadcast %4 : vector<1x32xf32> to vector<16x32xf32>
    %6 = arith.addf %3, %5 : vector<16x32xf32>
    %c0_5 = arith.constant 0 : index
    %c0_6 = arith.constant 0 : index
    %7 = vector.load %arg4[%c0_5, %c0_6] : memref<32x32xbf16, #tpu.memory_space<vmem>>, vector<32x32xbf16>
    %cst_7 = arith.constant dense<0.000000e+00> : vector<16x32xf32>
    %8 = tpu.matmul %1, %7, %cst_7 {dimension_numbers = #tpu.dot_dimension_numbers<[1], [0], [0], [1], [0, 0, 1, 1], [], []>} : vector<16x32xbf16>, vector<32x32xbf16>, vector<16x32xf32> -> vector<16x32xf32>
    %c0_8 = arith.constant 0 : index
    %c0_9 = arith.constant 0 : index
    %9 = vector.load %arg5[%c0_8, %c0_9] : memref<32x32xbf16, #tpu.memory_space<vmem>>, vector<32x32xbf16>
    %cst_10 = arith.constant dense<0.000000e+00> : vector<16x32xf32>
    %10 = tpu.matmul %1, %9, %cst_10 {dimension_numbers = #tpu.dot_dimension_numbers<[1], [0], [0], [1], [0, 0, 1, 1], [], []>} : vector<16x32xbf16>, vector<32x32xbf16>, vector<16x32xf32> -> vector<16x32xf32>
    %c0_11 = arith.constant 0 : index
    %c0_12 = arith.constant 0 : index
    %11 = vector.load %arg6[%c0_11, %c0_12] : memref<1x32xf32, #tpu.memory_space<vmem>>, vector<1x32xf32>
    %12 = vector.broadcast %11 : vector<1x32xf32> to vector<16x32xf32>
    %13 = arith.addf %10, %12 : vector<16x32xf32>
    %14 = arith.truncf %6 : vector<16x32xf32> to vector<16x32xbf16>
    %c0_13 = arith.constant 0 : index
    %c0_14 = arith.constant 0 : index
    %15 = vector.load %arg7[%c0_13, %c0_14] : memref<16x32xbf16, #tpu.memory_space<vmem>>, vector<16x32xbf16>
    tpu.vector_store %arg7[%c0_13, %c0_14], %14 {strides = array<i32>} : memref<16x32xbf16, #tpu.memory_space<vmem>>, vector<16x32xbf16>,
    %16 = arith.truncf %8 : vector<16x32xf32> to vector<16x32xbf16>
    %c0_15 = arith.constant 0 : index
    %c0_16 = arith.constant 0 : index
    %17 = vector.load %arg8[%c0_15, %c0_16] : memref<16x32xbf16, #tpu.memory_space<vmem>>, vector<16x32xbf16>
    tpu.vector_store %arg8[%c0_15, %c0_16], %16 {strides = array<i32>} : memref<16x32xbf16, #tpu.memory_space<vmem>>, vector<16x32xbf16>,
    %18 = arith.truncf %13 : vector<16x32xf32> to vector<16x32xbf16>
    %c0_17 = arith.constant 0 : index
    %c0_18 = arith.constant 0 : index
    %19 = vector.load %arg9[%c0_17, %c0_18] : memref<16x32xbf16, #tpu.memory_space<vmem>>, vector<16x32xbf16>
    tpu.vector_store %arg9[%c0_17, %c0_18], %18 {strides = array<i32>} : memref<16x32xbf16, #tpu.memory_space<vmem>>, vector<16x32xbf16>,
    return
  }
  func.func @transform_0(%arg0: i32) -> (i32, i32) {
    %c0_i32 = arith.constant 0 : i32
    %c0_i32_0 = arith.constant 0 : i32
    return %arg0, %c0_i32 : i32, i32
  }
  func.func @transform_1(%arg0: i32) -> (i32, i32) {
    %c0_i32 = arith.constant 0 : i32
    %c0_i32_0 = arith.constant 0 : i32
    %c0_i32_1 = arith.constant 0 : i32
    return %c0_i32, %c0_i32_0 : i32, i32
  }
  func.func @transform_2(%arg0: i32) -> (i32, i32) {
    %c0_i32 = arith.constant 0 : i32
    %c0_i32_0 = arith.constant 0 : i32
    %c0_i32_1 = arith.constant 0 : i32
    return %c0_i32, %c0_i32_0 : i32, i32
  }
  func.func @transform_3(%arg0: i32) -> (i32, i32) {
    %c0_i32 = arith.constant 0 : i32
    %c0_i32_0 = arith.constant 0 : i32
    %c0_i32_1 = arith.constant 0 : i32
    return %c0_i32, %c0_i32_0 : i32, i32
  }
  func.func @transform_4(%arg0: i32) -> (i32, i32) {
    %c0_i32 = arith.constant 0 : i32
    %c0_i32_0 = arith.constant 0 : i32
    %c0_i32_1 = arith.constant 0 : i32
    return %c0_i32, %c0_i32_0 : i32, i32
  }
  func.func @transform_5(%arg0: i32) -> (i32, i32) {
    %c0_i32 = arith.constant 0 : i32
    %c0_i32_0 = arith.constant 0 : i32
    %c0_i32_1 = arith.constant 0 : i32
    return %c0_i32, %c0_i32_0 : i32, i32
  }
  func.func @transform_6(%arg0: i32) -> (i32, i32) {
    %c0_i32 = arith.constant 0 : i32
    %c0_i32_0 = arith.constant 0 : i32
    return %arg0, %c0_i32 : i32, i32
  }
  func.func @transform_7(%arg0: i32) -> (i32, i32) {
    %c0_i32 = arith.constant 0 : i32
    %c0_i32_0 = arith.constant 0 : i32
    return %arg0, %c0_i32 : i32, i32
  }
  func.func @transform_8(%arg0: i32) -> (i32, i32) {
    %c0_i32 = arith.constant 0 : i32
    %c0_i32_0 = arith.constant 0 : i32
    return %arg0, %c0_i32 : i32, i32
  }
}

</mosaic_0001>

<bundles_post_ra>
// kernel: tpu_custom_call.1
= control target key start
LH: loop header
LB: loop body
LE: loop exit
PB: predicated region body
PF: predicated region fallthrough
CT: control target
= control target key end

     0   :  { %14 = vsyncpa [#allocation3], 0  ;;  %s597_s0 = inlined_call_operand.hbm [shape: f32[16,32], index: 0, kind: input, shape index: {}]   ;;  %s598_s1 = inlined_call_operand.hbm [shape: bf16[32,32], index: 1, kind: input, shape index: {}]   ;;  %s599_s2 = inlined_call_operand.vmem [shape: f32[1,32], index: 2, kind: input, shape index: {}]   ;;  %s600_s3 = inlined_call_operand.hbm [shape: bf16[32,32], index: 3, kind: input, shape index: {}]   ;;  %s601_s4 = inlined_call_operand.hbm [shape: bf16[32,32], index: 4, kind: input, shape index: {}]   ;;  %s602_s5 = inlined_call_operand.vmem [shape: f32[1,32], index: 5, kind: input, shape index: {}]   ;;  %s603_s6 = inlined_call_operand.hbm [shape: bf16[16,32], index: 6, kind: output, shape index: {0}]   ;;  %s604_s7 = inlined_call_operand.hbm [shape: bf16[16,32], index: 7, kind: output, shape index: {1}]   ;;  %s605_s8 = inlined_call_operand.hbm [shape: bf16[16,32], index: 8, kind: output, shape index: {2}]  }
   0x1   :  { %15 = vsyncpa [#allocation6], 0 }
   0x2   :  { %16 = vsyncpa [#allocation9], 0 }
   0x3   :  { %17 = vsyncpa [#allocation4], 0  ;;  %s36_s29 = sshll.u32 %s598_s1, 4  ;;  %s37_s29 = int_to_ptr.hbm [resolvable:$true] %s36_s29 }
   0x4   :  { %18 = vsyncpa [#allocation12], 0  ;;  %s490_s30 = smov [#allocation5]   ;;  %s23_s12 = sshll.u32 %s597_s0, 4  ;;  %s24_s12 = int_to_ptr.hbm [resolvable:$true] %s23_s12 }
   0x5   :  { %s38_s9 = sshll.u32 %s490_s30, 4  ;;  %s491_s13 = smov 64   ;;  %s39_s9 = int_to_ptr.vmem [resolvable:$true] %s38_s9 }
   0x6   :  { %s492_s14 = smov 4   ;;  %s493_s15 = smov [#allocation2]  }
   0x7   :  { %44 = dma.hbm_to_vmem [thread:$0]  %s37_s29, 256, %s39_s9, [#allocation6], %s491_s13, %s491_s13, %s492_s14  }
   0x8   :  { %s25_s16 = sshll.u32 %s493_s15, 4  ;;  %s494_s1 = smov 128   ;;  %s26_s16 = int_to_ptr.vmem [resolvable:$true] %s25_s16 }
   0x9   :  { %s495_s17 = smov 8   ;;  %s51_s20 = sshll.u32 %s600_s3, 4  ;;  %s52_s20 = int_to_ptr.hbm [resolvable:$true] %s51_s20 }
   0xa   :  { %31 = dma.hbm_to_vmem [thread:$0]  %s24_s12, 256, %s26_s16, [#allocation3], %s494_s1, %s494_s1, %s495_s17  }
   0xb   :  { %s496_s21 = smov [#allocation7]   ;;  %s64_s24 = sshll.u32 %s601_s4, 4  ;;  %s65_s24 = int_to_ptr.hbm [resolvable:$true] %s64_s24 }
   0xc   :  { %s53_s0 = sshll.u32 %s496_s21, 4  ;;  %s497_s25 = smov [#allocation8]   ;;  %s54_s0 = int_to_ptr.vmem [resolvable:$true] %s53_s0 }
   0xd   :  { %59 = dma.hbm_to_vmem [thread:$0]  %s52_s20, 256, %s54_s0, [#allocation6], %s491_s13, %s491_s13, %s492_s14  }
   0xe   :  { %s66_s26 = sshll.u32 %s497_s25, 4  ;;  %s67_s26 = int_to_ptr.vmem [resolvable:$true] %s66_s26 }
   0xf   :  { %72 = dma.hbm_to_vmem [thread:$0]  %s65_s24, 256, %s67_s26, [#allocation9], %s491_s13, %s491_s13, %s492_s14  }
  0x10   :  { %480 = dma.done.wait [#allocation3], 256  }
  0x11   :  { %481 = vsyncadd [#allocation3], 4294967040 }
  0x12   :  { %482 = dma.done.wait [#allocation6], 512  }
  0x13   :  { %483 = vsyncadd [#allocation6], 4294966784 }
  0x14   :  { %484 = dma.done.wait [#allocation9], 256  }
  0x15   :  { %485 = vsyncadd [#allocation9], 4294967040  ;;  %v294_v0 = vld [vmem:[#allocation5 + $0x8] sm:$0xff]  ;;  %v296_v1 = vld [vmem:[#allocation7 + $0x8] sm:$0xff]  ;;  %vm115_vm0 = vcmask 261120   ;;  %vm199_vm1 = vcmask 257024  }
  0x16   :  { %v298_v2 = vld [vmem:[#allocation8 + $0x8] sm:$0xff]  ;;  %v293_v3 = vld [vmem:[#allocation5] sm:$0xff]  ;;  %v295_v4 = vld [vmem:[#allocation7] sm:$0xff]  ;;  %125 = vmatpush.bf16.msra.mxu0 %v294_v0  ;;  %155 = vmatpush.bf16.msra.mxu1 %v296_v1  ;;  %s498_s29 = smov [#allocation11]   ;;  %s216_s15 = sshll.u32 %s603_s6, 4  ;;  %s217_s15 = int_to_ptr.hbm [resolvable:$true] %s216_s15 }
  0x17   :  { %v92_v5 = vld [vmem:[#allocation2] sm:$0xff]  ;;  %v93_v6 = vld [vmem:[#allocation2 + $0x8] sm:$0xff]  ;;  %189 = vmatpush.bf16.msra.mxu2 %v298_v2  ;;  %v297_v7 = vld [vmem:[#allocation8] sm:$0xff]  ;;  %s227_s30 = sshll.u32 %s498_s29, 4  ;;  %s499_s16 = smov [#allocation10]   ;;  %s228_s30 = int_to_ptr.vmem [resolvable:$true] %s227_s30 }
  0x18   :  { %v94_v8 = vpack.c.bf16 %v93_v6, %v92_v5  ;;  %v310_v9 = vld [vmem:[%s599_s2] ss:$0 sm:$0xff]  ;;  %s229_s2 = sshll.u32 %s604_s7, 4  ;;  %s214_s1 = sshll.u32 %s499_s16, 4  ;;  %s230_s2 = int_to_ptr.hbm [resolvable:$true] %s229_s2  ;;  %s215_s1 = int_to_ptr.vmem [resolvable:$true] %s214_s1 }
  0x19   :  { %v311_v15 = vld [vmem:[%s602_s5] ss:$0 sm:$0xff]  ;;  %s500_s5 = smov [#allocation13]   ;;  %s242_s18 = sshll.u32 %s605_s8, 4  ;;  %s243_s18 = int_to_ptr.hbm [resolvable:$true] %s242_s18 }
  0x1a   :  { %126 = vmatpush.bf16.msra.mxu0 %v293_v3  ;;  %156 = vmatpush.bf16.msra.mxu1 %v295_v4  ;;  %s240_s6 = sshll.u32 %s500_s5, 4  ;;  %s241_s6 = int_to_ptr.vmem [resolvable:$true] %s240_s6 }
  0x1b   :  { %190 = vmatpush.bf16.msra.mxu2 %v297_v7 }
  0x1d   :  { %274 = vmatmul.msk.bf16.vlgmr.msra.gmra.mxu0 %vm115_vm0, %v94_v8  ;;  %283 = vmatmul.msk.bf16.vlgmr.msra.gmra.mxu1 %vm115_vm0, %v94_v8 }
  0x1e   :  { %292 = vmatmul.msk.bf16.vlgmr.msra.gmra.mxu2 %vm115_vm0, %v94_v8 }
  0x9a   :  { %v128_v10 = vpop.f32.mrf.mxu0  ;;  %v158_v11 = vpop.f32.mrf.mxu1 }
  0x9b   :  { %v129_v12 = vadd.f32 %v310_v9, %v128_v10  ;;  %v202_v13 = vpack.c.bf16 %v158_v11, %v158_v11 }
  0x9d   :  { %v197_v14 = vpack.c.bf16 %v129_v12, %v129_v12  ;;  %204 = vst.msk [vmem:[#allocation11] sm:$0xf] %vm199_vm1, %v202_v13 }
  0x9f   :  { %200 = vst.msk [vmem:[#allocation10] sm:$0xf] %vm199_vm1, %v197_v14 }
  0xa1   :  { %v192_v16 = vpop.f32.mrf.mxu2 }
  0xa2   :  { %v193_v17 = vadd.f32 %v311_v15, %v192_v16  ;;  %v130_v18 = vpop.f32.mrf.mxu0  ;;  %v160_v19 = vpop.f32.mrf.mxu1 }
  0xa3   :  { %v131_v20 = vadd.f32 %v310_v9, %v130_v18  ;;  %v203_v21 = vpack.c.bf16 %v160_v19, %v160_v19 }
  0xa4   :  { %v206_v22 = vpack.c.bf16 %v193_v17, %v193_v17 }
  0xa5   :  { %v198_v23 = vpack.c.bf16 %v131_v20, %v131_v20  ;;  %205 = vst.msk [vmem:[#allocation11 + $0x4] sm:$0xf] %vm199_vm1, %v203_v21 }
  0xa6   :  { %208 = vst.msk [vmem:[#allocation13] sm:$0xf] %vm199_vm1, %v206_v22  ;;  %235 = dma.vmem_to_hbm [thread:$0]  %s228_s30, 128, %s230_s2, [#allocation12], %s491_s13, %s491_s13, %s492_s14  }
  0xa7   :  { %201 = vst.msk [vmem:[#allocation10 + $0x4] sm:$0xf] %vm199_vm1, %v198_v23 }
  0xa8   :  { %222 = dma.vmem_to_hbm [thread:$0]  %s215_s1, 128, %s217_s15, [#allocation4], %s491_s13, %s491_s13, %s492_s14  }
  0xa9   :  { %v194_v24 = vpop.f32.mrf.mxu2 }
  0xaa   :  { %v195_v25 = vadd.f32 %v311_v15, %v194_v24 }
  0xac   :  { %v207_v26 = vpack.c.bf16 %v195_v25, %v195_v25 }
  0xae   :  { %209 = vst.msk [vmem:[#allocation13 + $0x4] sm:$0xf] %vm199_vm1, %v207_v26 }
  0xaf   :  { %248 = dma.vmem_to_hbm [thread:$0]  %s241_s6, 128, %s243_s18, [#allocation12], %s491_s13, %s491_s13, %s492_s14  }
  0xb0   :  { %486 = dma.done.wait [#allocation4], 128  }
  0xb1   :  { %487 = vsyncadd [#allocation4], 4294967168 }
  0xb2   :  { %488 = dma.done.wait [#allocation12], 256  }
  0xb3   :  { %489 = vsyncadd [#allocation12], 4294967040 }
  0xb4   :  { %261 = vsyncpa [#allocation3], 1 }
  0xb5   :  { %262 = vsyncpa [#allocation6], 1 }
  0xb6   :  { %263 = vsyncpa [#allocation9], 1 }
  0xb7   :  { %264 = vsyncpa [#allocation4], 1 }
  0xb8   :  { %265 = vsyncpa [#allocation12], 1 }

</bundles_post_ra>
